<compile_context>
chip_gen: v7x
topology: tpu7x:2x2x1
jax: 0.10.0
libtpu: 0.0.40
codegen_flags: <defaults>
</compile_context>

<pallas_src>
import math
import functools

import jax
import jax.numpy as jnp
from jax.experimental import pallas as pl
from jax.experimental.pallas import tpu as pltpu

# scipy.constants values (hardcoded so the script is self-contained)
_H = 6.62607015e-34        # Planck constant
_E = 1.602176634e-19       # elementary charge
_C = 299792458.0           # speed of light
_M0 = 9.1093837015e-31     # electron mass


def _get_ewavelength(U):
    # Matches CTFRelion._get_ewavelength (Angstrom)
    return (_H / math.sqrt(2.0 * _M0 * _E * U)
            / math.sqrt(1.0 + _E * U / (2.0 * _M0 * _C ** 2)) * 1e10)


def _round_up(a, m):
    return ((a + m - 1) // m) * m


def ctf_kernel(params_ref, planes_ref, xre_ref, xim_ref, yre_ref, yim_ref, *,
               delta, apply_env):
    """One grid step: build the CTF filter for tb_rows rows and apply it.

    params_ref : (tb_rows, 8)  f32 VMEM  per-row scalars
                 [cs | aAst | cos(2 aAst) | sin(2 aAst) | mean_defocus | 0 0 0]
    planes_ref : (8, SS)       f32 VMEM  resident precomputed planes
    xre_ref/xim_ref : (tb_rows, SS) f32 VMEM  planar real/imag input blocks
    yre_ref/yim_ref : (tb_rows, SS) f32 VMEM  output blocks
    """
    p = params_ref[...]                     # (tb_rows, 8)
    cs_c  = p[:, 0:1]                       # (tb_rows, 1) columns
    aA_c  = p[:, 1:2]
    c2a_c = p[:, 2:3]
    s2a_c = p[:, 3:4]
    ld_c  = p[:, 4:5]

    r4k  = planes_ref[0:1, :]               # (pi/2 * wl^3) * r2^2
    r2k2 = planes_ref[1:2, :]               # (pi * wl) * r2
    c2af = planes_ref[2:3, :]               # cos(2 * angleFrequency)
    s2af = planes_ref[3:4, :]               # sin(2 * angleFrequency)

    # cos(2*(af - aAst)) via angle-difference identity (no per-element trig).
    cos2angle = c2af * c2a_c + s2af * s2a_c                 # (tb_rows, SS)
    local_defocus = ld_c + aA_c * cos2angle
    gamma = cs_c * r4k - r2k2 * local_defocus
    # -pc*sin(g - pp) + ac*cos(g - pp) == cos(g + delta),
    # delta = atan2(pc, ac) - pp  (single transcendental per element)
    h = jnp.cos(gamma + delta)
    if apply_env:
        h = h * planes_ref[4:5, :]                          # Nyquist envelope

    yre_ref[...] = xre_ref[...] * h
    yim_ref[...] = xim_ref[...] * h


class CTFRelionPallas:
    """JAX/Pallas re-implementation of CTFRelion forward
    (device='cuda' semantics, variable_ctf=False, requires_grad=False)."""

    def __init__(self, size=16, resolution=0.8, kV=300.0, valueNyquist=0.001,
                 defocusU=1.0, defocusV=1.0, angleAstigmatism=0.0, cs=2.7,
                 phasePlate=0.0, amplitudeContrast=0.1, num_particles=8):
        self.size = size
        self.resolution = resolution
        self.kV = kV
        self.valueNyquist = valueNyquist
        self.phasePlate = phasePlate / 180.0 * math.pi
        self.amplitudeContrast = amplitudeContrast
        self.frequency = 1.0 / resolution
        self.wavelength = _get_ewavelength(kV * 1000.0)

        angleAstigmatism_rad = angleAstigmatism / 180.0 * math.pi
        cs_scaled = cs * 1e7

        # deterministic parameter init (matches nn.Parameter constant init)
        ones = jnp.ones((num_particles, 1, 1), jnp.float32)
        self.defocusU = defocusU * ones
        self.defocusV = defocusV * ones
        self.angleAstigmatism = angleAstigmatism_rad * ones
        self.cs = cs_scaled * ones

        # frequency-plane buffers (torch.meshgrid default is 'ij' indexing)
        ax = jnp.linspace(-1.0 / (2.0 * resolution), 1.0 / (2.0 * resolution),
                          size, dtype=jnp.float32)
        mx, my = jnp.meshgrid(ax, ax, indexing='ij')
        self.r2 = (mx ** 2 + my ** 2).astype(jnp.float32)
        self.angleFrequency = jnp.arctan2(my, mx).astype(jnp.float32)

        # ---- precomputed resident planes, lane-dense (8, S*S) ----
        ss = size * size
        r2f = self.r2.reshape(ss)
        aff = self.angleFrequency.reshape(ss)
        wl = self.wavelength
        row_r4 = ((math.pi / 2.0) * wl ** 3) * r2f * r2f
        row_r2 = (math.pi * wl) * r2f
        row_c2 = jnp.cos(2.0 * aff)
        row_s2 = jnp.sin(2.0 * aff)
        if valueNyquist != 1:
            decay = math.sqrt(-math.log(valueNyquist)) * 2.0 * resolution
            row_env = jnp.exp(-self.frequency * decay * decay * r2f)
            self.apply_env = True
        else:
            row_env = jnp.ones((ss,), jnp.float32)
            self.apply_env = False
        zero = jnp.zeros((ss,), jnp.float32)
        self.planes = jnp.stack(
            [row_r4, row_r2, row_c2, row_s2, row_env, zero, zero, zero],
            axis=0).astype(jnp.float32)

        ac = amplitudeContrast
        pc = math.sqrt(1.0 - ac * ac)
        self.delta = math.atan2(pc, ac) - self.phasePlate

    def forward(self, x_fourier, idcs):
        if x_fourier.ndim == 3:
            x_fourier = x_fourier[None, ...]
        B = int(idcs.shape[0])
        C = int(x_fourier.shape[1])
        S = int(x_fourier.shape[-1])
        SS = S * S
        assert S == self.size, "only the size-matched path is implemented"
        # TODO(synk): oversample/pad/crop FFT path not implemented in-kernel.

        # ---- block sizing ----------------------------------------------
        # Rows of the flattened streams (one row per (particle, channel)).
        R = B * C
        row_bytes = SS * 4
        # Target ~1 MiB of input per stream per grid step so per-step overhead
        # (~0.35 us) is negligible vs HBM time; cap rows and keep a multiple
        # of 8 so every block is (8,128)-dense.
        target_rows = max(8, min(1024, (1 << 20) // row_bytes))
        target_rows = _round_up(target_rows, 8)
        if R <= target_rows:
            tb_rows = _round_up(max(R, 1), 8)   # one bigger step (v5e/v6e-best)
        else:
            tb_rows = target_rows               # nblk >= 2 -> both v7x cores fed
        nblk = pl.cdiv(R, tb_rows)
        r_pad = nblk * tb_rows

        # ---- planar f32 streams (no concatenate pack/unpack passes) -----
        x_re = jnp.real(x_fourier).astype(jnp.float32).reshape(R, SS)
        x_im = jnp.imag(x_fourier).astype(jnp.float32).reshape(R, SS)
        if r_pad != R:
            x_re = jnp.pad(x_re, ((0, r_pad - R), (0, 0)))
            x_im = jnp.pad(x_im, ((0, r_pad - R), (0, 0)))

        # ---- per-row scalar table, (r_pad, 8) f32 VMEM ------------------
        dU = self.defocusU[idcs, 0, 0]
        dV = self.defocusV[idcs, 0, 0]
        aA = self.angleAstigmatism[idcs, 0, 0]
        cs = self.cs[idcs, 0, 0]
        ld = 10000.0 * (dU + dV) / 2.0
        zero = jnp.zeros_like(cs)
        params = jnp.stack(
            [cs, aA, jnp.cos(2.0 * aA), jnp.sin(2.0 * aA), ld,
             zero, zero, zero], axis=1).astype(jnp.float32)     # (B, 8)
        if C > 1:
            params = jnp.repeat(params, C, axis=0)              # (B*C, 8)
        if r_pad != R:
            params = jnp.pad(params, ((0, r_pad - R), (0, 0)))

        kernel = functools.partial(
            ctf_kernel, delta=self.delta, apply_env=self.apply_env)

        data_spec = pl.BlockSpec((tb_rows, SS), lambda b: (b, 0))
        grid_spec = pltpu.PrefetchScalarGridSpec(
            num_scalar_prefetch=0,
            grid=(nblk,),
            in_specs=[
                pl.BlockSpec((tb_rows, 8), lambda b: (b, 0)),   # params
                pl.BlockSpec((8, SS), lambda b: (0, 0)),        # planes (resident)
                data_spec,                                      # x real
                data_spec,                                      # x imag
            ],
            out_specs=[data_spec, data_spec],
        )

        y_re, y_im = pl.pallas_call(
            kernel,
            grid_spec=grid_spec,
            out_shape=(jax.ShapeDtypeStruct((r_pad, SS), jnp.float32),
                       jax.ShapeDtypeStruct((r_pad, SS), jnp.float32)),
            compiler_params=pltpu.CompilerParams(
                dimension_semantics=("parallel",)),
        )(params, self.planes, x_re, x_im)

        y_re = y_re[:R].reshape(B, C, S, S)
        y_im = y_im[:R].reshape(B, C, S, S)
        return jax.lax.complex(y_re, y_im)


def reference_forward(ctf, x_fourier, idcs):
    """Pure-JAX mirror of CTFRelion.forward (size-matched path)."""
    if x_fourier.ndim == 3:
        x_fourier = x_fourier[None, ...]
    dU = ctf.defocusU[idcs]            # (B,1,1)
    dV = ctf.defocusV[idcs]
    aAst = ctf.angleAstigmatism[idcs]
    cs = ctf.cs[idcs]
    ac = ctf.amplitudeContrast
    pc = math.sqrt(1.0 - ac ** 2)
    K1 = math.pi / 2.0 * cs * ctf.wavelength ** 3
    K2 = math.pi * ctf.wavelength
    angle = ctf.angleFrequency[None] - aAst
    local_defocus = 10000.0 * (dU + dV) / 2.0 + aAst * jnp.cos(2.0 * angle)
    gamma = K1 * ctf.r2[None] ** 2 - K2 * ctf.r2[None] * local_defocus - ctf.phasePlate
    h = -pc * jnp.sin(gamma) + ac * jnp.cos(gamma)
    if ctf.valueNyquist != 1:
        decay = math.sqrt(-math.log(ctf.valueNyquist)) * 2.0 * ctf.resolution
        h = h * jnp.exp(-ctf.frequency * decay ** 2 * ctf.r2[None])
    return x_fourier * h[:, None, :, :].astype(jnp.complex64)


if __name__ == "__main__":
    B, C, S = 4, 1, 16
    NUM_PARTICLES = 8

    ctf = CTFRelionPallas(size=S, num_particles=NUM_PARTICLES)

    key = jax.random.PRNGKey(0)
    k_re, k_im = jax.random.split(key)
    x_re = jax.random.normal(k_re, (B, C, S, S), dtype=jnp.float32)
    x_im = jax.random.normal(k_im, (B, C, S, S), dtype=jnp.float32)
    x_fourier = jax.lax.complex(x_re, x_im)          # complex64, NCHW
    idcs = jnp.array([1, 5, 2, 7], dtype=jnp.int32)

    out = jax.block_until_ready(ctf.forward(x_fourier, idcs))
    ref = jax.block_until_ready(reference_forward(ctf, x_fourier, idcs))

    assert out.shape == (B, C, S, S) and out.dtype == jnp.complex64
    # slightly relaxed tol: gamma is O(500) rad, so single-cos identity vs
    # sin/cos pair differ by a few f32 ulps of the argument after reduction
    assert jnp.allclose(out.real, ref.real, atol=2e-3, rtol=2e-3)
    assert jnp.allclose(out.imag, ref.imag, atol=2e-3, rtol=2e-3)

    print("KERNEL_OK")
</pallas_src>

<mosaic_0001>
module attributes {stable_mosaic.version = 11 : i64} {
  func.func @ctf_kernel(%arg0: i32, %arg1: memref<8x8xf32, #tpu.memory_space<vmem>>, %arg2: memref<8x256xf32, #tpu.memory_space<vmem>>, %arg3: memref<8x256xf32, #tpu.memory_space<vmem>>, %arg4: memref<8x256xf32, #tpu.memory_space<vmem>>, %arg5: memref<8x256xf32, #tpu.memory_space<vmem>>, %arg6: memref<8x256xf32, #tpu.memory_space<vmem>>) attributes {dimension_semantics = [#tpu.dimension_semantics<parallel>], iteration_bounds = array<i64: 1>, scalar_prefetch = 0 : i64, scratch_operands = 0 : i64, tpu.core_type = #tpu.core_type<tc>, window_params = [{transform_indices = @transform_0, window_bounds = array<i64: 8, 8>}, {pipeline_mode = #tpu.pipeline_mode<synchronous>, transform_indices = @transform_1, window_bounds = array<i64: 8, 256>}, {transform_indices = @transform_2, window_bounds = array<i64: 8, 256>}, {transform_indices = @transform_3, window_bounds = array<i64: 8, 256>}, {transform_indices = @transform_4, window_bounds = array<i64: 8, 256>}, {transform_indices = @transform_5, window_bounds = array<i64: 8, 256>}]} {
    %c0 = arith.constant 0 : index
    %c0_0 = arith.constant 0 : index
    %0 = vector.load %arg1[%c0, %c0_0] : memref<8x8xf32, #tpu.memory_space<vmem>>, vector<8x8xf32>
    %1 = vector.extract_strided_slice %0 {offsets = [0, 0], sizes = [8, 1], strides = [1, 1]} : vector<8x8xf32> to vector<8x1xf32>
    %2 = vector.extract_strided_slice %0 {offsets = [0, 1], sizes = [8, 1], strides = [1, 1]} : vector<8x8xf32> to vector<8x1xf32>
    %3 = vector.extract_strided_slice %0 {offsets = [0, 2], sizes = [8, 1], strides = [1, 1]} : vector<8x8xf32> to vector<8x1xf32>
    %4 = vector.extract_strided_slice %0 {offsets = [0, 3], sizes = [8, 1], strides = [1, 1]} : vector<8x8xf32> to vector<8x1xf32>
    %5 = vector.extract_strided_slice %0 {offsets = [0, 4], sizes = [8, 1], strides = [1, 1]} : vector<8x8xf32> to vector<8x1xf32>
    %c0_1 = arith.constant 0 : index
    %c0_2 = arith.constant 0 : index
    %6 = vector.load %arg2[%c0_1, %c0_2] : memref<8x256xf32, #tpu.memory_space<vmem>>, vector<1x256xf32>
    %c1 = arith.constant 1 : index
    %c0_3 = arith.constant 0 : index
    %7 = vector.load %arg2[%c1, %c0_3] : memref<8x256xf32, #tpu.memory_space<vmem>>, vector<1x256xf32>
    %c2 = arith.constant 2 : index
    %c0_4 = arith.constant 0 : index
    %8 = vector.load %arg2[%c2, %c0_4] : memref<8x256xf32, #tpu.memory_space<vmem>>, vector<1x256xf32>
    %c3 = arith.constant 3 : index
    %c0_5 = arith.constant 0 : index
    %9 = vector.load %arg2[%c3, %c0_5] : memref<8x256xf32, #tpu.memory_space<vmem>>, vector<1x256xf32>
    %10 = vector.broadcast %8 : vector<1x256xf32> to vector<8x256xf32>
    %11 = vector.broadcast %3 : vector<8x1xf32> to vector<8x256xf32>
    %12 = arith.mulf %10, %11 : vector<8x256xf32>
    %13 = vector.broadcast %9 : vector<1x256xf32> to vector<8x256xf32>
    %14 = vector.broadcast %4 : vector<8x1xf32> to vector<8x256xf32>
    %15 = arith.mulf %13, %14 : vector<8x256xf32>
    %16 = arith.addf %12, %15 : vector<8x256xf32>
    %17 = vector.broadcast %2 : vector<8x1xf32> to vector<8x256xf32>
    %18 = arith.mulf %17, %16 : vector<8x256xf32>
    %19 = vector.broadcast %5 : vector<8x1xf32> to vector<8x256xf32>
    %20 = arith.addf %19, %18 : vector<8x256xf32>
    %21 = vector.broadcast %1 : vector<8x1xf32> to vector<8x256xf32>
    %22 = vector.broadcast %6 : vector<1x256xf32> to vector<8x256xf32>
    %23 = arith.mulf %21, %22 : vector<8x256xf32>
    %24 = vector.broadcast %7 : vector<1x256xf32> to vector<8x256xf32>
    %25 = arith.mulf %24, %20 : vector<8x256xf32>
    %26 = arith.subf %23, %25 : vector<8x256xf32>
    %cst = arith.constant 1.47062886 : f32
    %27 = vector.broadcast %cst : f32 to vector<8x256xf32>
    %28 = arith.addf %26, %27 : vector<8x256xf32>
    %29 = math.cos %28 : vector<8x256xf32>
    %c4 = arith.constant 4 : index
    %c0_6 = arith.constant 0 : index
    %30 = vector.load %arg2[%c4, %c0_6] : memref<8x256xf32, #tpu.memory_space<vmem>>, vector<1x256xf32>
    %31 = vector.broadcast %30 : vector<1x256xf32> to vector<8x256xf32>
    %32 = arith.mulf %29, %31 : vector<8x256xf32>
    %c0_7 = arith.constant 0 : index
    %c0_8 = arith.constant 0 : index
    %33 = vector.load %arg3[%c0_7, %c0_8] : memref<8x256xf32, #tpu.memory_space<vmem>>, vector<8x256xf32>
    %34 = arith.mulf %33, %32 : vector<8x256xf32>
    %c0_9 = arith.constant 0 : index
    %c0_10 = arith.constant 0 : index
    %35 = vector.load %arg5[%c0_9, %c0_10] : memref<8x256xf32, #tpu.memory_space<vmem>>, vector<8x256xf32>
    tpu.vector_store %arg5[%c0_9, %c0_10], %34 {strides = array<i32>} : memref<8x256xf32, #tpu.memory_space<vmem>>, vector<8x256xf32>,
    %c0_11 = arith.constant 0 : index
    %c0_12 = arith.constant 0 : index
    %36 = vector.load %arg4[%c0_11, %c0_12] : memref<8x256xf32, #tpu.memory_space<vmem>>, vector<8x256xf32>
    %37 = arith.mulf %36, %32 : vector<8x256xf32>
    %c0_13 = arith.constant 0 : index
    %c0_14 = arith.constant 0 : index
    %38 = vector.load %arg6[%c0_13, %c0_14] : memref<8x256xf32, #tpu.memory_space<vmem>>, vector<8x256xf32>
    tpu.vector_store %arg6[%c0_13, %c0_14], %37 {strides = array<i32>} : memref<8x256xf32, #tpu.memory_space<vmem>>, vector<8x256xf32>,
    return
  }
  func.func @transform_0(%arg0: i32) -> (i32, i32) {
    %c0_i32 = arith.constant 0 : i32
    %c0_i32_0 = arith.constant 0 : i32
    return %arg0, %c0_i32 : i32, i32
  }
  func.func @transform_1(%arg0: i32) -> (i32, i32) {
    %c0_i32 = arith.constant 0 : i32
    %c0_i32_0 = arith.constant 0 : i32
    %c0_i32_1 = arith.constant 0 : i32
    return %c0_i32, %c0_i32_0 : i32, i32
  }
  func.func @transform_2(%arg0: i32) -> (i32, i32) {
    %c0_i32 = arith.constant 0 : i32
    %c0_i32_0 = arith.constant 0 : i32
    return %arg0, %c0_i32 : i32, i32
  }
  func.func @transform_3(%arg0: i32) -> (i32, i32) {
    %c0_i32 = arith.constant 0 : i32
    %c0_i32_0 = arith.constant 0 : i32
    return %arg0, %c0_i32 : i32, i32
  }
  func.func @transform_4(%arg0: i32) -> (i32, i32) {
    %c0_i32 = arith.constant 0 : i32
    %c0_i32_0 = arith.constant 0 : i32
    return %arg0, %c0_i32 : i32, i32
  }
  func.func @transform_5(%arg0: i32) -> (i32, i32) {
    %c0_i32 = arith.constant 0 : i32
    %c0_i32_0 = arith.constant 0 : i32
    return %arg0, %c0_i32 : i32, i32
  }
}

</mosaic_0001>

<bundles_post_ra>
// kernel: tpu_custom_call.1
= control target key start
LH: loop header
LB: loop body
LE: loop exit
PB: predicated region body
PF: predicated region fallthrough
CT: control target
= control target key end

     0   :  { %11 = vsyncpa [#allocation3], 0  ;;  %s823_s0 = inlined_call_operand.hbm [shape: f32[8,8], index: 0, kind: input, shape index: {}]   ;;  %s824_s1 = inlined_call_operand.hbm [shape: f32[8,256], index: 1, kind: input, shape index: {}]   ;;  %s825_s2 = inlined_call_operand.hbm [shape: f32[8,256], index: 2, kind: input, shape index: {}]   ;;  %s826_s3 = inlined_call_operand.hbm [shape: f32[8,256], index: 3, kind: input, shape index: {}]   ;;  %s827_s4 = inlined_call_operand.hbm [shape: f32[8,256], index: 4, kind: output, shape index: {0}]   ;;  %s828_s5 = inlined_call_operand.hbm [shape: f32[8,256], index: 5, kind: output, shape index: {1}]  }
   0x1   :  { %12 = vsyncpa [#allocation6], 0 }
   0x2   :  { %13 = vsyncpa [#allocation9], 0 }
   0x3   :  { %14 = vsyncpa [#allocation4], 0 }
   0x4   :  { %15 = vsyncpa [#allocation12], 0  ;;  %s612_s18 = smov [#allocation5]   ;;  %s613_s20 = smov [#allocation2]  }
   0x5   :  { %s32_s19 = sshll.u32 %s612_s18, 4  ;;  %s22_s21 = sshll.u32 %s613_s20, 4  ;;  %s33_s19 = int_to_ptr.vmem [resolvable:$true] %s32_s19  ;;  %s23_s21 = int_to_ptr.vmem [resolvable:$true] %s22_s21 }
   0x6   :  { %s470_s24 = scalar_lea.hbm %s824_s1, 256 }
   0x7   :  { %p471_p0 = scmp.ne.s32.totalorder %s824_s1, %s470_s24  ;;  %p474_p1 = scmp.lt.u32.totalorder %s470_s24, %s824_s1 }
   0x9   :  { %p476_p2 = pnand %p474_p1, %p471_p0 }
   0xb   :  { %479 = shalt.err (!%p476_p2)
}
   0xc   :  { %s480_s29 = scalar_lea.vmem %s33_s19, 256  ;;  %p485_p4 = scmp.lt.s32.totalorder %s33_s19, %s33_s19 }
   0xd   :  { %p481_p3 = scmp.ne.s32.totalorder %s33_s19, %s480_s29  ;;  %p486_p5 = scmp.lt.s32.totalorder %s480_s29, %s480_s29 }
   0xf   :  { %p487_p6 = por %p486_p5, %p485_p4 }
  0x11   :  { %p488_p7 = pnand %p487_p6, %p481_p3 }
  0x13   :  { %491 = shalt.err (!%p488_p7)
}
  0x14   :  { %35 = dma.hbm_to_vmem [thread:$0]  %s824_s1, 256, %s33_s19, [#allocation6]  }
  0x15   :  { %s492_s9 = scalar_lea.hbm %s823_s0, 128 }
  0x16   :  { %p493_p8 = scmp.ne.s32.totalorder %s823_s0, %s492_s9  ;;  %p496_p9 = scmp.lt.u32.totalorder %s492_s9, %s823_s0 }
  0x18   :  { %p498_p10 = pnand %p496_p9, %p493_p8 }
  0x1a   :  { %501 = shalt.err (!%p498_p10)
}
  0x1b   :  { %s502_s14 = scalar_lea.vmem %s23_s21, 128  ;;  %p507_p12 = scmp.lt.s32.totalorder %s23_s21, %s23_s21 }
  0x1c   :  { %p503_p11 = scmp.ne.s32.totalorder %s23_s21, %s502_s14  ;;  %p508_p13 = scmp.lt.s32.totalorder %s502_s14, %s502_s14 }
  0x1e   :  { %p509_p0 = por %p508_p13, %p507_p12 }
  0x20   :  { %p510_p1 = pnand %p509_p0, %p503_p11 }
  0x22   :  { %513 = shalt.err (!%p510_p1)
}
  0x23   :  { %25 = dma.hbm_to_vmem [thread:$0]  %s823_s0, 128, %s23_s21, [#allocation3]  }
  0x24   :  { %s614_s16 = smov [#allocation7]   ;;  %s615_s18 = smov [#allocation8]  }
  0x25   :  { %s42_s17 = sshll.u32 %s614_s16, 4  ;;  %s52_s19 = sshll.u32 %s615_s18, 4  ;;  %s43_s17 = int_to_ptr.vmem [resolvable:$true] %s42_s17  ;;  %s53_s19 = int_to_ptr.vmem [resolvable:$true] %s52_s19 }
  0x26   :  { %s514_s23 = scalar_lea.hbm %s825_s2, 256 }
  0x27   :  { %p515_p2 = scmp.ne.s32.totalorder %s825_s2, %s514_s23  ;;  %p518_p3 = scmp.lt.u32.totalorder %s514_s23, %s825_s2 }
  0x29   :  { %p520_p4 = pnand %p518_p3, %p515_p2 }
  0x2b   :  { %523 = shalt.err (!%p520_p4)
}
  0x2c   :  { %s524_s0 = scalar_lea.vmem %s43_s17, 256  ;;  %p529_p6 = scmp.lt.s32.totalorder %s43_s17, %s43_s17 }
  0x2d   :  { %p525_p5 = scmp.ne.s32.totalorder %s43_s17, %s524_s0  ;;  %p530_p7 = scmp.lt.s32.totalorder %s524_s0, %s524_s0 }
  0x2f   :  { %p531_p8 = por %p530_p7, %p529_p6 }
  0x31   :  { %p532_p9 = pnand %p531_p8, %p525_p5 }
  0x33   :  { %535 = shalt.err (!%p532_p9)
}
  0x34   :  { %45 = dma.hbm_to_vmem [thread:$0]  %s825_s2, 256, %s43_s17, [#allocation6]  }
  0x35   :  { %s536_s6 = scalar_lea.hbm %s826_s3, 256 }
  0x36   :  { %p537_p10 = scmp.ne.s32.totalorder %s826_s3, %s536_s6  ;;  %p540_p11 = scmp.lt.u32.totalorder %s536_s6, %s826_s3 }
  0x38   :  { %p542_p12 = pnand %p540_p11, %p537_p10 }
  0x3a   :  { %545 = shalt.err (!%p542_p12)
}
  0x3b   :  { %s546_s11 = scalar_lea.vmem %s53_s19, 256  ;;  %p551_p0 = scmp.lt.s32.totalorder %s53_s19, %s53_s19 }
  0x3c   :  { %p547_p13 = scmp.ne.s32.totalorder %s53_s19, %s546_s11  ;;  %p552_p1 = scmp.lt.s32.totalorder %s546_s11, %s546_s11 }
  0x3e   :  { %p553_p2 = por %p552_p1, %p551_p0 }
  0x40   :  { %p554_p3 = pnand %p553_p2, %p547_p13 }
  0x42   :  { %557 = shalt.err (!%p554_p3)
}
  0x43   :  { %55 = dma.hbm_to_vmem [thread:$0]  %s826_s3, 256, %s53_s19, [#allocation9]  }
  0x44   :  { %602 = dma.done.wait [#allocation3], 128  }
  0x45   :  { %603 = vsyncadd [#allocation3], 4294967168 }
  0x46   :  { %604 = dma.done.wait [#allocation6], 512  }
  0x47   :  { %605 = vsyncadd [#allocation6], 4294966784 }
  0x48   :  { %606 = dma.done.wait [#allocation9], 256  }
  0x49   :  { %607 = vsyncadd [#allocation9], 4294967040  ;;  %v616_v0 = vmov 2   ;;  %v617_v1 = vmov 1   ;;  %v68_v2 = vld [vmem:[#allocation2] sm:$0xff]  ;;  %v618_v3 = vmov 3   ;;  %v77_v6 = vlaneseq }
  0x4a   :  { %456 = vset.pattern.permute.xlu0 %v616_v0  ;;  %458 = vset.pattern.permute.xlu1 %v617_v1  ;;  %v619_v4 = vmov 4   ;;  %v620_v5 = vmov 0   ;;  %v73_v10 = vld [vmem:[#allocation5 + $0x2] ss:$8 sm:$0x3]  ;;  %s627_s3 = smov [#allocation10]  }
  0x4b   :  { %89 = vperm.xlu0 %456, %v68_v2   ;;  %114 = vperm.xlu1 %458, %v68_v2   ;;  %v78_v7 = vshrl.u32 %v77_v6, 7  ;;  %v75_v11 = vld [vmem:[#allocation5 + $0x3] ss:$8 sm:$0x3]  ;;  %v621_v1 = vmov 683565275  }
  0x4c   :  { %v69_v20 = vld [vmem:[#allocation5] ss:$8 sm:$0x3]  ;;  %v71_v25 = vld [vmem:[#allocation5 + $0x1] ss:$8 sm:$0x3] }
  0x4d   :  { %v707_v8 = vsub.s32 0, %v78_v7  ;;  %v709_v9 = vsub.s32 1, %v78_v7  ;;  %v623_v7 = vmov 2131351028   ;;  %s398_s13 = sshll.u32 %s627_s3, 4  ;;  %s628_s14 = smov [#allocation11]   ;;  %s399_s13 = int_to_ptr.vmem [resolvable:$true] %s398_s13 }
  0x4e   :  { %s408_s1 = sshll.u32 %s628_s14, 4  ;;  %s558_s15 = scalar_lea.vmem %s399_s13, 256  ;;  %s409_s1 = int_to_ptr.vmem [resolvable:$true] %s408_s1 }
  0x4f   :  { %457 = vset.pattern.permute.xlu0 %v618_v3  ;;  %459 = vset.pattern.permute.xlu1 %v619_v4  ;;  %v80_v14 = vrot.slane %v73_v10, %v707_v8  ;;  %v84_v15 = vrot.slane %v73_v10, %v709_v9  ;;  %v98_v16 = vrot.slane %v75_v11, %v707_v8  ;;  %p559_p4 = scmp.ne.s32.totalorder %s399_s13, %s558_s15  ;;  %p563_p5 = scmp.lt.s32.totalorder %s399_s13, %s399_s13 }
  0x50   :  { %106 = vperm.xlu0 %457, %v68_v2   ;;  %120 = vperm.xlu1 %459, %v68_v2   ;;  %v102_v17 = vrot.slane %v75_v11, %v709_v9  ;;  %v133_v28 = vrot.slane %v69_v20, %v707_v8  ;;  %v137_v29 = vrot.slane %v69_v20, %v709_v9  ;;  %v624_v11 = vmov 2102212464   ;;  %p564_p6 = scmp.lt.s32.totalorder %s558_s15, %s558_s15 }
  0x51   :  { %v146_v30 = vrot.slane %v71_v25, %v707_v8  ;;  %v150_v31 = vrot.slane %v71_v25, %v709_v9  ;;  %v626_v20 = vmov 1326507024  }
  0x52   :  { %p565_p7 = por %p564_p6, %p563_p5 }
  0x54   :  { %460 = vset.pattern.permute.xlu1 %v620_v5  ;;  %461 = vset.pattern.permute.xlu0 %v620_v5  ;;  %v622_v5 = vmov 2475754826   ;;  %p566_p8 = pnand %p565_p7, %p559_p4 }
  0x55   :  { %126 = vperm.xlu1 %460, %v68_v2  }
  0xca   :  { %v90_v12 = vpop.permute.xlu0 %89  ;;  %v115_v13 = vpop.permute.xlu1 %114 }
  0xcb   :  { %v92_v21 = vmul.f32 %v90_v12, %v80_v14  ;;  %v93_v22 = vmul.f32 %v90_v12, %v84_v15 }
  0xcf   :  { %v107_v18 = vpop.permute.xlu0 %106  ;;  %v121_v19 = vpop.permute.xlu1 %120 }
  0xd0   :  { %v109_v23 = vmul.f32 %v107_v18, %v98_v16  ;;  %v110_v24 = vmul.f32 %v107_v18, %v102_v17 }
  0xd2   :  { %v111_v26 = vadd.f32 %v109_v23, %v92_v21  ;;  %v112_v27 = vadd.f32 %v110_v24, %v93_v22 }
  0xd4   :  { %v117_v32 = vmul.f32 %v115_v13, %v111_v26  ;;  %v118_v33 = vmul.f32 %v115_v13, %v112_v27  ;;  %v127_v34 = vpop.permute.xlu1 %126  ;;  %v625_v13 = vmov 920167782  }
  0xd5   :  { %v140_v37 = vmul.f32 %v133_v28, %v127_v34  ;;  %v141_v38 = vmul.f32 %v137_v29, %v127_v34 }
  0xd6   :  { %v123_v35 = vadd.f32 %v121_v19, %v117_v32  ;;  %v124_v36 = vadd.f32 %v121_v19, %v118_v33 }
  0xd8   :  { %v153_v39 = vmul.f32 %v146_v30, %v123_v35  ;;  %v154_v40 = vmul.f32 %v150_v31, %v124_v36 }
  0xda   :  { %v155_v41 = vsub.f32 %v140_v37, %v153_v39  ;;  %v156_v42 = vsub.f32 %v141_v38, %v154_v40 }
  0xdc   :  { %v719_v43 = vadd.f32 1.4706289, %v155_v41  ;;  %v721_v44 = vadd.f32 1.4706289, %v156_v42 }
  0xde   :  { %v159_v45 = vand.u32 2147483647, %v719_v43  ;;  %v162_v46 = vand.u32 2139095040, %v719_v43  ;;  %v265_v47 = vand.u32 2139095040, %v721_v44  ;;  %v262_v50 = vand.u32 2147483647, %v721_v44 }
  0xdf   :  { %vm161_vm14 = vcmp.lt.s32.totalorder %v719_v43, 0 }
  0xe0   :  { %v163_v48 = vshrl.u32 %v162_v46, 23  ;;  %v166_v49 = vand.u32 8388607, %v159_v45  ;;  %v266_v51 = vshrl.u32 %v265_v47, 23  ;;  %v731_v56 = vand.u32 8388607, %v262_v50 }
  0xe1   :  { %vm774_vm15 = vcmp.le.f32.partialorder %v159_v45, 0.7853982 }
  0xe2   :  { %v423_v52 = vadd.s32 4294967169, %v163_v48  ;;  %v427_v53 = vadd.s32 4294967169, %v266_v51  ;;  %v167_v55 = vor.u32 8388608, %v166_v49  ;;  %v270_v63 = vor.u32 8388608, %v731_v56 }
  0xe4   :  { %v169_v54 = vadd.s32 1, %v423_v52  ;;  %v272_v57 = vadd.s32 1, %v427_v53  ;;  %v733_v62 = vshll.u32 %v167_v55, 8 }
  0xe6   :  { %vm170_vm0 = vcmp.gt.s32.totalorder %v169_v54, 0  ;;  %vm273_vm1 = vcmp.gt.s32.totalorder %v272_v57, 0 }
  0xe7   :  { %v171_v58 = vsel %vm170_vm0, %v169_v54, 0  ;;  %v274_v61 = vsel %vm273_vm1, %v272_v57, 0  ;;  %vm264_vm0 = vcmp.lt.s32.totalorder %v721_v44, 0  ;;  %vm786_vm1 = vcmp.le.f32.partialorder %v262_v50, 0.7853982 }
  0xe8   :  { %v172_v59 = vshrl.u32 %v171_v58, 5  ;;  %v173_v60 = vand.u32 31, %v171_v58  ;;  %v736_v3 = vshrl.u32 %v274_v61, 5  ;;  %v276_v4 = vand.u32 31, %v274_v61 }
  0xea   :  { %v174_v0 = vsub.s32 32, %v173_v60  ;;  %v176_v2 = vshll.u32 %v621_v1, %v173_v60  ;;  %v179_v6 = vshll.u32 %v622_v5, %v173_v60  ;;  %v182_v10 = vshll.u32 %v623_v7, %v173_v60 }
  0xeb   :  { %v185_v12 = vshll.u32 %v624_v11, %v173_v60  ;;  %v188_v14 = vshll.u32 %v625_v13, %v173_v60  ;;  %vm191_vm2 = vcmp.lt.s32.totalorder %v172_v59, 1  ;;  %vm192_vm3 = vcmp.lt.s32.totalorder %v172_v59, 2 }
  0xec   :  { %v177_v15 = vshrl.u32 %v622_v5, %v174_v0  ;;  %v180_v16 = vshrl.u32 %v623_v7, %v174_v0  ;;  %v183_v17 = vshrl.u32 %v624_v11, %v174_v0  ;;  %v175_v18 = vshrl.u32 %v621_v1, %v174_v0 }
  0xed   :  { %v186_v19 = vshrl.u32 %v625_v13, %v174_v0  ;;  %v189_v21 = vshrl.u32 %v626_v20, %v174_v0  ;;  %v277_v25 = vsub.s32 32, %v276_v4  ;;  %vm193_vm4 = vcmp.lt.s32.totalorder %v172_v59, 3 }
  0xee   :  { %v178_v22 = vor.u32 %v177_v15, %v176_v2  ;;  %v181_v23 = vor.u32 %v180_v16, %v179_v6  ;;  %v184_v24 = vor.u32 %v183_v17, %v182_v10  ;;  %vm194_vm5 = vcmp.lt.s32.totalorder %v172_v59, 4 }
  0xef   :  { %v187_v26 = vor.u32 %v186_v19, %v185_v12  ;;  %v190_v27 = vor.u32 %v189_v21, %v188_v14  ;;  %v279_v35 = vshll.u32 %v621_v1, %v276_v4  ;;  %v280_v38 = vshrl.u32 %v622_v5, %v277_v25 }
  0xf0   :  { %v195_v28 = vsel %vm191_vm2, %v175_v18, %v178_v22  ;;  %v196_v29 = vsel %vm194_vm5, %v184_v24, 2102212464  ;;  %v199_v30 = vsel %vm191_vm2, %v178_v22, %v181_v23  ;;  %v203_v31 = vsel %vm191_vm2, %v181_v23, %v184_v24 }
  0xf1   :  { %v197_v32 = vsel %vm193_vm4, %v181_v23, %v196_v29  ;;  %v200_v33 = vsel %vm194_vm5, %v187_v26, 920167782  ;;  %v204_v34 = vsel %vm194_vm5, %v190_v27, 1326507024  ;;  %v282_v39 = vshll.u32 %v622_v5, %v276_v4 }
  0xf2   :  { %v201_v36 = vsel %vm193_vm4, %v184_v24, %v200_v33  ;;  %v205_v37 = vsel %vm193_vm4, %v187_v26, %v204_v34  ;;  %v198_v40 = vsel %vm192_vm3, %v195_v28, %v197_v32  ;;  %v283_v46 = vshrl.u32 %v623_v7, %v277_v25 }
  0xf3   :  { %v202_v41 = vsel %vm192_vm3, %v199_v30, %v201_v36  ;;  %v206_v42 = vsel %vm192_vm3, %v203_v31, %v205_v37  ;;  %v281_v52 = vor.u32 %v280_v38, %v279_v35  ;;  %v285_v54 = vshll.u32 %v623_v7, %v276_v4 }
  0xf4   :  { %v745_v47 = vmul.u32.u64.low %v733_v62, %v206_v42  ;;  %v746_v48 = vmul.u32.u64.high %v733_v62, %v206_v42, %v745_v47  ;;  %v749_v49 = vmul.u32.u64.low %v733_v62, %v202_v41  ;;  %v750_v51 = vmul.u32.u64.high %v733_v62, %v202_v41, %v749_v49 }
  0xf5   :  { %v284_v53 = vor.u32 %v283_v46, %v282_v39  ;;  %v286_v55 = vshrl.u32 %v624_v11, %v277_v25  ;;  %v288_v56 = vshll.u32 %v624_v11, %v276_v4  ;;  %v289_v57 = vshrl.u32 %v625_v13, %v277_v25 }
  0xf6   :  { %v292_v58 = vshrl.u32 %v626_v20, %v277_v25  ;;  %v310_v60 = vshll.u32 %v270_v63, 8  ;;  %v214_v59 = vmul.u32 %v733_v62, %v198_v40  ;;  %v278_v61 = vshrl.u32 %v621_v1, %v277_v25 }
  0xf7   :  { %v287_v0 = vor.u32 %v286_v55, %v285_v54  ;;  %v291_v2 = vshll.u32 %v625_v13, %v276_v4  ;;  %vm216_vm6 = vc.u32 %v746_v48, %v749_v49  ;;  %v217_v5 = vadd.s32 1, %v750_v51 }
  0xf8   :  { %v290_v6 = vor.u32 %v289_v57, %v288_v56  ;;  %vm294_vm7 = vcmp.lt.s32.totalorder %v736_v3, 1  ;;  %vm296_vm8 = vcmp.lt.s32.totalorder %v736_v3, 3  ;;  %vm297_vm9 = vcmp.lt.s32.totalorder %v736_v3, 4 }
  0xf9   :  { %v293_v10 = vor.u32 %v292_v58, %v291_v2  ;;  %v302_v7 = vsel %vm294_vm7, %v281_v52, %v284_v53  ;;  %v218_v63 = vsel %vm216_vm6, %v217_v5, %v750_v51  ;;  %v299_v11 = vsel %vm297_vm9, %v287_v0, 2102212464 }
  0xfa   :  { %v303_v62 = vsel %vm297_vm9, %v290_v6, 920167782  ;;  %v306_v1 = vsel %vm294_vm7, %v284_v53, %v287_v0  ;;  %v219_v12 = vadd.s32 %v218_v63, %v214_v59  ;;  %vm295_vm10 = vcmp.lt.s32.totalorder %v736_v3, 2 }
  0xfb   :  { %v304_v4 = vsel %vm296_vm8, %v287_v0, %v303_v62  ;;  %v307_v13 = vsel %vm297_vm9, %v293_v10, 1326507024  ;;  %v298_v14 = vsel %vm294_vm7, %v278_v61, %v281_v52  ;;  %v300_v15 = vsel %vm296_vm8, %v284_v53, %v299_v11 }
  0xfc   :  { %v305_v16 = vsel %vm295_vm10, %v302_v7, %v304_v4  ;;  %v308_v17 = vsel %vm296_vm8, %v290_v6, %v307_v13  ;;  %v220_v18 = vadd.s32 536870912, %v219_v12  ;;  %v301_v25 = vsel %vm295_vm10, %v298_v14, %v300_v15 }
  0xfd   :  { %v309_v19 = vsel %vm295_vm10, %v306_v1, %v308_v17  ;;  %v760_v20 = vmul.u32.u64.low %v310_v60, %v305_v16  ;;  %v761_v21 = vmul.u32.u64.high %v310_v60, %v305_v16, %v760_v20  ;;  %v317_v3 = vmul.u32 %v310_v60, %v301_v25  ;;  %v366_v25 = vld [vmem:[#allocation5 + $0x4] ss:$8 sm:$0x3] }
  0xfe   :  { %v763_v22 = vmul.u32.u64.low %v310_v60, %v309_v19  ;;  %v764_v23 = vmul.u32.u64.high %v310_v60, %v309_v19, %v763_v22  ;;  %v221_v24 = vshrl.u32 %v220_v18, 30  ;;  %v215_v41 = vadd.s32 %v749_v49, %v746_v48 }
  0xff   :  { %v320_v27 = vadd.s32 1, %v761_v21  ;;  %vm251_vm5 = vweird.f32 %v719_v43  ;;  %vm354_vm9 = vweird.f32 %v721_v44 }
 0x100   :  { %v222_v26 = vshll.u32 %v221_v24, 30  ;;  %vm319_vm11 = vc.u32 %v764_v23, %v760_v20  ;;  %v318_v0 = vadd.s32 %v760_v20, %v764_v23 }
 0x101   :  { %v321_v29 = vsel %vm319_vm11, %v320_v27, %v761_v21 }
 0x102   :  { %v223_v28 = vsub.s32 %v219_v12, %v222_v26  ;;  %v322_v30 = vadd.s32 %v321_v29, %v317_v3  ;;  %v245_v12 = vsub.s32 4, %v221_v24  ;;  %v371_v29 = vrot.slane %v366_v25, %v707_v8 }
 0x104   :  { %v225_v31 = vsub.s32 0, %v223_v28  ;;  %v323_v32 = vadd.s32 536870912, %v322_v30  ;;  %v246_v16 = vsel %vm161_vm14, %v245_v12, %v221_v24 }
 0x105   :  { %v248_v45 = vsel %vm774_vm15, 0, %v246_v16 }
 0x106   :  { %v424_v33 = vmin.u32 %v225_v31, %v223_v28  ;;  %v324_v34 = vshrl.u32 %v323_v32, 30  ;;  %v252_v23 = vand.u32 3, %v248_v45 }
 0x108   :  { %v227_v35 = vclz %v424_v33  ;;  %v325_v36 = vshll.u32 %v324_v34, 30  ;;  %v348_v21 = vsub.s32 4, %v324_v34  ;;  %vm257_vm2 = vcmp.eq.s32.totalorder %v252_v23, 2 }
 0x109   :  { %vm254_vm3 = vcmp.eq.s32.totalorder %v252_v23, 0  ;;  %vm253_vm4 = vcmp.lt.s32.totalorder %v252_v23, 2 }
 0x10a   :  { %v425_v37 = vadd.s32 4294967294, %v227_v35  ;;  %v326_v38 = vsub.s32 %v322_v30, %v325_v36  ;;  %v349_v3 = vsel %vm264_vm0, %v348_v21, %v324_v34  ;;  %v380_v35 = vld [vmem:[#allocation7] sm:$0xff]  ;;  %v386_v36 = vld [vmem:[#allocation8] sm:$0xff] }
 0x10b   :  { %v351_v31 = vsel %vm786_vm1, 0, %v349_v3 }
 0x10c   :  { %vm426_vm12 = vcmp.lt.s32.totalorder %v425_v37, 0  ;;  %v328_v40 = vsub.s32 0, %v326_v38 }
 0x10d   :  { %v230_v39 = vsel %vm426_vm12, 0, %v425_v37  ;;  %v355_v37 = vand.u32 3, %v351_v31 }
 0x10e   :  { %v231_v42 = vsub.s32 32, %v230_v39  ;;  %v235_v46 = vsub.s32 4294967266, %v230_v39  ;;  %v428_v47 = vmin.u32 %v328_v40, %v326_v38  ;;  %v232_v51 = vshll.u32 %v223_v28, %v230_v39 }
 0x10f   :  { %vm360_vm6 = vcmp.eq.s32.totalorder %v355_v37, 2  ;;  %vm357_vm7 = vcmp.eq.s32.totalorder %v355_v37, 0  ;;  %vm356_vm8 = vcmp.lt.s32.totalorder %v355_v37, 2 }
 0x110   :  { %v233_v52 = vshrl.u32 %v215_v41, %v231_v42  ;;  %v236_v53 = vadd.s32 127, %v235_v46  ;;  %v330_v54 = vclz %v428_v47  ;;  %v375_v47 = vrot.slane %v366_v25, %v709_v9 }
 0x112   :  { %v234_v55 = vor.u32 %v233_v52, %v232_v51  ;;  %v237_v56 = vshll.u32 %v236_v53, 23  ;;  %v429_v57 = vadd.s32 4294967294, %v330_v54  ;;  %v381_v53 = vld [vmem:[#allocation7 + $0x8] sm:$0xff]  ;;  %v387_v54 = vld [vmem:[#allocation8 + $0x8] sm:$0xff] }
 0x114   :  { %v238_v58 = vor.u32 4788187, %v237_v56  ;;  %vm430_vm13 = vcmp.lt.s32.totalorder %v429_v57, 0  ;;  %v241_v59 = vcvt.s32.f32 %v234_v55 }
 0x115   :  { %v333_v61 = vsel %vm430_vm13, 0, %v429_v57 }
 0x116   :  { %v239_v60 = vand.u32 2147483647, %v238_v58  ;;  %v334_v2 = vsub.s32 32, %v333_v61  ;;  %v338_v5 = vsub.s32 4294967266, %v333_v61  ;;  %v335_v49 = vshll.u32 %v326_v38, %v333_v61 }
 0x118   :  { %v242_v48 = vmul.f32 %v241_v59, %v239_v60  ;;  %v336_v6 = vshrl.u32 %v318_v0, %v334_v2  ;;  %v339_v10 = vadd.s32 127, %v338_v5 }
 0x11a   :  { %v243_v7 = vxor.u32 2147483648, %v242_v48  ;;  %v337_v63 = vor.u32 %v336_v6, %v335_v49  ;;  %v340_v11 = vshll.u32 %v339_v10, 23 }
 0x11c   :  { %v244_v1 = vsel %vm161_vm14, %v243_v7, %v242_v48  ;;  %v341_v13 = vor.u32 4788187, %v340_v11  ;;  %v344_v15 = vcvt.s32.f32 %v337_v63 }
 0x11d   :  { %v247_v4 = vsel %vm774_vm15, %v719_v43, %v244_v1 }
 0x11e   :  { %462 = vcosq.f32 %v247_v4  ;;  %v342_v14 = vand.u32 2147483647, %v341_v13 }
 0x11f   :  { %464 = vsinq.f32 %v247_v4 }
 0x120   :  { %v345_v17 = vmul.f32 %v344_v15, %v342_v14 }
 0x122   :  { %v346_v18 = vxor.u32 2147483648, %v345_v17 }
 0x124   :  { %v347_v20 = vsel %vm264_vm0, %v346_v18, %v345_v17 }
 0x125   :  { %v350_v22 = vsel %vm786_vm1, %v721_v44, %v347_v20 }
 0x126   :  { %466 = vcosq.f32 %v350_v22 }
 0x127   :  { %468 = vsinq.f32 %v350_v22 }
 0x128   :  { %v463_v24 = vpop.eup %462 }
 0x129   :  { %v465_v26 = vpop.eup %464  ;;  %v258_v27 = vxor.u32 2147483648, %v463_v24 }
 0x12a   :  { %v255_v28 = vxor.u32 2147483648, %v465_v26 }
 0x12b   :  { %v259_v50 = vsel %vm257_vm2, %v258_v27, %v465_v26 }
 0x12c   :  { %v256_v30 = vsel %vm254_vm3, %v463_v24, %v255_v28 }
 0x12d   :  { %v260_v32 = vsel %vm253_vm4, %v256_v30, %v259_v50 }
 0x12e   :  { %v261_v33 = vsel %vm251_vm5, nan, %v260_v32 }
 0x12f   :  { %v378_v38 = vmul.f32 %v371_v29, %v261_v33 }
 0x130   :  { %v467_v34 = vpop.eup %466 }
 0x131   :  { %v382_v39 = vmul.f32 %v380_v35, %v378_v38  ;;  %v388_v40 = vmul.f32 %v386_v36, %v378_v38  ;;  %v469_v41 = vpop.eup %468  ;;  %v361_v42 = vxor.u32 2147483648, %v467_v34 }
 0x132   :  { %v358_v46 = vxor.u32 2147483648, %v469_v41 }
 0x133   :  { %384 = vst [vmem:[#allocation10] sm:$0xff] %v382_v39  ;;  %390 = vst [vmem:[#allocation11] sm:$0xff] %v388_v40  ;;  %v362_v8 = vsel %vm360_vm6, %v361_v42, %v469_v41 }
 0x134   :  { %v359_v43 = vsel %vm357_vm7, %v467_v34, %v358_v46 }
 0x135   :  { %v363_v51 = vsel %vm356_vm8, %v359_v43, %v362_v8 }
 0x136   :  { %v364_v52 = vsel %vm354_vm9, nan, %v363_v51 }
 0x137   :  { %v379_v55 = vmul.f32 %v375_v47, %v364_v52 }
 0x139   :  { %v383_v56 = vmul.f32 %v381_v53, %v379_v55  ;;  %v389_v57 = vmul.f32 %v387_v54, %v379_v55 }
 0x13b   :  { %385 = vst [vmem:[#allocation10 + $0x8] sm:$0xff] %v383_v56  ;;  %391 = vst [vmem:[#allocation11 + $0x8] sm:$0xff] %v389_v57 }
 0x13c   :  { %569 = shalt.err (!%p566_p8)
}
 0x13d   :  { %s570_s18 = scalar_lea.hbm %s827_s4, 256 }
 0x13e   :  { %p571_p9 = scmp.ne.s32.totalorder %s827_s4, %s570_s18  ;;  %p574_p10 = scmp.lt.u32.totalorder %s570_s18, %s827_s4 }
 0x140   :  { %p576_p11 = pnand %p574_p10, %p571_p9 }
 0x142   :  { %579 = shalt.err (!%p576_p11)
}
 0x143   :  { %401 = dma.vmem_to_hbm [thread:$0]  %s399_s13, 256, %s827_s4, [#allocation4]  }
 0x144   :  { %s580_s26 = scalar_lea.vmem %s409_s1, 256  ;;  %p585_p13 = scmp.lt.s32.totalorder %s409_s1, %s409_s1 }
 0x145   :  { %p581_p12 = scmp.ne.s32.totalorder %s409_s1, %s580_s26  ;;  %p586_p0 = scmp.lt.s32.totalorder %s580_s26, %s580_s26 }
 0x147   :  { %p587_p1 = por %p586_p0, %p585_p13 }
 0x149   :  { %p588_p2 = pnand %p587_p1, %p581_p12 }
 0x14b   :  { %591 = shalt.err (!%p588_p2)
}
 0x14c   :  { %s592_s21 = scalar_lea.hbm %s828_s5, 256 }
 0x14d   :  { %p593_p3 = scmp.ne.s32.totalorder %s828_s5, %s592_s21  ;;  %p596_p4 = scmp.lt.u32.totalorder %s592_s21, %s828_s5 }
 0x14f   :  { %p598_p5 = pnand %p596_p4, %p593_p3 }
 0x151   :  { %601 = shalt.err (!%p598_p5)
}
 0x152   :  { %411 = dma.vmem_to_hbm [thread:$0]  %s409_s1, 256, %s828_s5, [#allocation12]  }
 0x153   :  { %608 = dma.done.wait [#allocation4], 256  }
 0x154   :  { %609 = vsyncadd [#allocation4], 4294967040 }
 0x155   :  { %610 = dma.done.wait [#allocation12], 256  }
 0x156   :  { %611 = vsyncadd [#allocation12], 4294967040 }
 0x157   :  { %418 = vsyncpa [#allocation3], 1 }
 0x158   :  { %419 = vsyncpa [#allocation6], 1 }
 0x159   :  { %420 = vsyncpa [#allocation9], 1 }
 0x15a   :  { %421 = vsyncpa [#allocation4], 1 }
 0x15b   :  { %422 = vsyncpa [#allocation12], 1 }

</bundles_post_ra>
